<compile_context>
chip_gen: v7x
topology: tpu7x:2x2x1
jax: 0.10.0
libtpu: 0.0.40
codegen_flags: <defaults>
</compile_context>

<pallas_src>
import math

import jax
import jax.numpy as jnp
from jax import lax
from jax.experimental import pallas as pl
from jax.experimental.pallas import tpu as pltpu

NOISE_SCALE = 5000.0

# ---------------- model dims ----------------
B = 2                  # batch
L = 8                  # sequence length
C = 32                 # config.single_channel
CP = 32                # config.enlarge_seq_channel
E = 64                 # global_config.esm_num
MAX_LEN = 32           # config.max_enlarge_seq_len
M = B * L              # flattened rows

# ---------------- lane-dense constant-slab layout: [SLAB_ROWS, 2*C] ---------
#   rows [0:E)          lanes [0:C)   : w1                [E, C]
#   rows [0:MAX_LEN)    lanes [C:2C)  : pe_ws = pe@wp@ws  [MAX_LEN, C]
#   rows [MAX_LEN:2*32) lanes [C:2C)  : ws_e  = w2@ws     [C, C]
#   row  E + 0          lanes [0:C)   : b1
#   row  E + 1          lanes [0:C)   : base  = (bp+b2)@ws + bs + cond_emb[0]
#   row  E + 2          lanes [0:C)   : cdelta = cond_emb[1] - cond_emb[0]
#   row  E + 3          lanes [0:C)   : nfreq  = [noise_emb | noise_emb]
_VEC_R0 = E
SLAB_ROWS = E + 8      # 72 (8-row aligned)
SLAB_COLS = 2 * C      # 64


# ---------------- Pallas kernel ----------------
def diff_single_encoder_kernel(idx_ref, cond_ref, t_ref, esm_ref, slab_ref, o_ref):
    f32 = jnp.float32

    # static views into the lane-dense constant slab (VMEM, no extra DMA)
    w1 = slab_ref[0:E, 0:C]                               # [E, C]
    pe_ws = slab_ref[0:MAX_LEN, C:2 * C]                  # [MAX_LEN, C]
    ws_e = slab_ref[MAX_LEN:MAX_LEN + C, C:2 * C]         # [C, C]
    b1 = slab_ref[_VEC_R0 + 0:_VEC_R0 + 1, 0:C]           # [1, C]
    base = slab_ref[_VEC_R0 + 1:_VEC_R0 + 2, 0:C]         # [1, C]
    cdelta = slab_ref[_VEC_R0 + 2:_VEC_R0 + 3, 0:C]       # [1, C]
    nfreq = slab_ref[_VEC_R0 + 3:_VEC_R0 + 4, 0:C]        # [1, C]

    # --- position branch: gather-as-one-hot fused into folded table (MXU #1) -
    lane = lax.broadcasted_iota(jnp.int32, (M, MAX_LEN), 1)
    onehot = (idx_ref[...] == lane).astype(f32)                         # [M, MAX_LEN]
    pos_c = jnp.dot(onehot, pe_ws, preferred_element_type=f32)          # [M, C]

    # --- esm branch: relu(esm @ w1 + b1) @ (w2 @ ws)        (MXU #2, #3) -----
    h = jnp.maximum(
        jnp.dot(esm_ref[...], w1, preferred_element_type=f32) + b1, 0.0)
    esm_c = jnp.dot(h, ws_e, preferred_element_type=f32)                # [M, C]

    # --- ContinousNoiseSchedual (EUP): per-row t, sin | cos halves ----------
    r_iota = lax.broadcasted_iota(jnp.int32, (M, B), 0)
    lo = lax.broadcasted_iota(jnp.int32, (M, B), 1) * L
    bsel = (r_iota >= lo) & (r_iota < lo + L)                           # row -> batch mask
    t_rows = jnp.sum(jnp.where(bsel, t_ref[...], 0.0),
                     axis=1, keepdims=True)                             # [M, 1]
    expo = NOISE_SCALE * t_rows * nfreq                                 # [M, C]
    first_half = lax.broadcasted_iota(jnp.int32, (M, C), 1) < (C // 2)
    t_emb = jnp.where(first_half, jnp.sin(expo), jnp.cos(expo))         # [M, C]

    # --- condition-embedding lerp + folded biases (VPU) ---------------------
    cond_f = cond_ref[...].astype(f32)                                  # [M, 1]
    o_ref[...] = pos_c + esm_c + t_emb + cond_f * cdelta + base


# ---------------- one-time constant preparation (hoisted out of forward) ----
def prepare_encoder_constants(params):
    """Fold all parameter algebra once and pack it into one lane-dense slab."""
    hi = jax.lax.Precision.HIGHEST
    ws = params["ws"]
    pe_ws = jnp.dot(jnp.dot(params["pe_table"], params["wp"], precision=hi),
                    ws, precision=hi)                                   # [MAX_LEN, C]
    ws_e = jnp.dot(params["w2"], ws, precision=hi)                      # [C, C]
    b_fold = jnp.dot(params["bp"] + params["b2"], ws, precision=hi) + params["bs"]
    base = b_fold + params["cond_emb"][0:1]                             # [1, C]
    cdelta = params["cond_emb"][1:2] - params["cond_emb"][0:1]          # [1, C]
    nfreq = jnp.concatenate([params["noise_emb"], params["noise_emb"]])[None, :]

    slab = jnp.zeros((SLAB_ROWS, SLAB_COLS), jnp.float32)
    slab = slab.at[0:E, 0:C].set(params["w1"])
    slab = slab.at[0:MAX_LEN, C:2 * C].set(pe_ws)
    slab = slab.at[MAX_LEN:MAX_LEN + C, C:2 * C].set(ws_e)
    slab = slab.at[_VEC_R0 + 0, 0:C].set(params["b1"][0])
    slab = slab.at[_VEC_R0 + 1, 0:C].set(base[0])
    slab = slab.at[_VEC_R0 + 2, 0:C].set(cdelta[0])
    slab = slab.at[_VEC_R0 + 3, 0:C].set(nfreq[0])
    return {"slab": slab}


# ---------------- forward wrapper ----------------
def diff_single_encoder(batch, esm, consts):
    """DiffSingleEncoder forward (extra_attention=False).

    `consts` is the output of prepare_encoder_constants(params) computed once.
    The wrapper only reshapes (bitcast-level) — all compute is in the kernel.
    """
    idx = batch["single_res_rel"].astype(jnp.int32).reshape(M, 1)
    cond = batch["condition"].astype(jnp.int32).reshape(M, 1)
    t = batch["t"].astype(jnp.float32).reshape(1, B)
    esm_flat = esm.astype(jnp.float32).reshape(M, E)

    vmem = pl.BlockSpec(memory_space=pltpu.MemorySpace.VMEM)
    out_flat = pl.pallas_call(
        diff_single_encoder_kernel,
        out_shape=jax.ShapeDtypeStruct((M, C), jnp.float32),
        in_specs=[vmem, vmem, vmem, vmem, vmem],
        out_specs=vmem,
    )(idx, cond, t, esm_flat, consts["slab"])
    return out_flat.reshape(B, L, C)


# ---------------- parameter construction (deterministic) ----------------
def make_params(key):
    ks = jax.random.split(key, 8)
    scale = 0.02

    # sinusoidal positional-encoding table (TransformerPositionEncoding)
    position = jnp.arange(MAX_LEN, dtype=jnp.float32)[:, None]
    div_term = jnp.exp(jnp.arange(0, CP, 2, dtype=jnp.float32)
                       * (-math.log(10000.0) / CP))
    pe = jnp.zeros((MAX_LEN, CP), jnp.float32)
    pe = pe.at[:, 0::2].set(jnp.sin(position * div_term))
    pe = pe.at[:, 1::2].set(jnp.cos(position * div_term))

    # ContinousNoiseSchedual buffer
    half = C // 2
    emb = jnp.exp(jnp.arange(half, dtype=jnp.float32)
                  * (-math.log(10000.0) / float(half - 1)))

    params = {
        "pe_table": pe,
        "noise_emb": emb,
        "wp": scale * jax.random.normal(ks[0], (CP, C), jnp.float32),
        "bp": 0.01 * jnp.ones((1, C), jnp.float32),
        "w1": scale * jax.random.normal(ks[1], (E, C), jnp.float32),
        "b1": 0.01 * jnp.ones((1, C), jnp.float32),
        "w2": scale * jax.random.normal(ks[2], (C, C), jnp.float32),
        "b2": 0.01 * jnp.ones((1, C), jnp.float32),
        "ws": scale * jax.random.normal(ks[3], (C, C), jnp.float32),
        "bs": 0.01 * jnp.ones((1, C), jnp.float32),
        "cond_emb": scale * jax.random.normal(ks[4], (2, C), jnp.float32),
    }
    return params


# ---------------- pure-JAX reference (unfused, mirrors the PyTorch module) ---
def reference_forward(batch, esm, params):
    hi = jax.lax.Precision.HIGHEST   # PyTorch fp32 matmuls -> true-f32 reference
    pos_emb = jnp.take(params["pe_table"], batch["single_res_rel"], axis=0)
    p = jnp.dot(pos_emb, params["wp"], precision=hi) + params["bp"][0]
    h = jnp.maximum(jnp.dot(esm, params["w1"], precision=hi) + params["b1"][0], 0.0)
    e = jnp.dot(h, params["w2"], precision=hi) + params["b2"][0]
    x = jnp.dot(p + e, params["ws"], precision=hi) + params["bs"][0]
    noise = jnp.reshape(batch["t"], (B,))
    expo = NOISE_SCALE * noise[:, None] * params["noise_emb"][None, :]
    t_emb = jnp.concatenate([jnp.sin(expo), jnp.cos(expo)], axis=-1)
    x = x + t_emb[:, None, :]
    x = x + jnp.take(params["cond_emb"], batch["condition"].astype(jnp.int32), axis=0)
    return x


if __name__ == "__main__":
    key = jax.random.PRNGKey(0)
    k_par, k_res, k_esm, k_t, k_cond = jax.random.split(key, 5)

    params = make_params(k_par)
    consts = prepare_encoder_constants(params)   # one-time setup, not per call

    batch = {
        "seq_mask": jnp.ones((B, L), jnp.float32),
        "single_res_rel": jax.random.randint(k_res, (B, L), 0, MAX_LEN),
        "t": jax.random.uniform(k_t, (B, 1), jnp.float32),
        "condition": jax.random.randint(k_cond, (B, L), 0, 2),
    }
    esm = jax.random.normal(k_esm, (B, L, E), jnp.float32)

    fwd = jax.jit(diff_single_encoder)
    out = jax.block_until_ready(fwd(batch, esm, consts))

    ref = reference_forward(batch, esm, params)
    assert out.shape == (B, L, C)
    err = jnp.max(jnp.abs(out - ref))
    # Tolerance: the constant fold reassociates the f32 matmul chain, the MXU
    # runs its multi-pass f32 path, and sin/cos now run on the TPU EUP whose
    # argument reduction may differ slightly from XLA's for exponents up to
    # NOISE_SCALE; all bounded well below 5e-4 at these magnitudes.
    assert jnp.allclose(out, ref, atol=5e-4, rtol=5e-4), f"max err {err}"

    print("KERNEL_OK")
</pallas_src>

<mosaic_0001>
module attributes {stable_mosaic.version = 11 : i64} {
  func.func @diff_single_encoder_kernel(%arg0: memref<16x1xi32, #tpu.memory_space<vmem>>, %arg1: memref<16x1xi32, #tpu.memory_space<vmem>>, %arg2: memref<1x2xf32, #tpu.memory_space<vmem>>, %arg3: memref<16x64xf32, #tpu.memory_space<vmem>>, %arg4: memref<72x64xf32, #tpu.memory_space<vmem>>, %arg5: memref<16x32xf32, #tpu.memory_space<vmem>>) attributes {dimension_semantics = [], scalar_prefetch = 0 : i64, scratch_operands = 0 : i64, tpu.core_type = #tpu.core_type<tc>} {
    %c0 = arith.constant 0 : index
    %c0_0 = arith.constant 0 : index
    %0 = vector.load %arg4[%c0, %c0_0] : memref<72x64xf32, #tpu.memory_space<vmem>>, vector<64x32xf32>
    %c0_1 = arith.constant 0 : index
    %c32 = arith.constant 32 : index
    %1 = vector.load %arg4[%c0_1, %c32] : memref<72x64xf32, #tpu.memory_space<vmem>>, vector<32x32xf32>
    %c32_2 = arith.constant 32 : index
    %c32_3 = arith.constant 32 : index
    %2 = vector.load %arg4[%c32_2, %c32_3] : memref<72x64xf32, #tpu.memory_space<vmem>>, vector<32x32xf32>
    %c64 = arith.constant 64 : index
    %c0_4 = arith.constant 0 : index
    %3 = vector.load %arg4[%c64, %c0_4] : memref<72x64xf32, #tpu.memory_space<vmem>>, vector<1x32xf32>
    %c65 = arith.constant 65 : index
    %c0_5 = arith.constant 0 : index
    %4 = vector.load %arg4[%c65, %c0_5] : memref<72x64xf32, #tpu.memory_space<vmem>>, vector<1x32xf32>
    %c66 = arith.constant 66 : index
    %c0_6 = arith.constant 0 : index
    %5 = vector.load %arg4[%c66, %c0_6] : memref<72x64xf32, #tpu.memory_space<vmem>>, vector<1x32xf32>
    %c67 = arith.constant 67 : index
    %c0_7 = arith.constant 0 : index
    %6 = vector.load %arg4[%c67, %c0_7] : memref<72x64xf32, #tpu.memory_space<vmem>>, vector<1x32xf32>
    %7 = tpu.iota {dimensions = array<i32: 1>} : vector<16x32xi32>
    %c0_8 = arith.constant 0 : index
    %c0_9 = arith.constant 0 : index
    %8 = vector.load %arg0[%c0_8, %c0_9] : memref<16x1xi32, #tpu.memory_space<vmem>>, vector<16x1xi32>
    %9 = vector.broadcast %8 : vector<16x1xi32> to vector<16x32xi32>
    %10 = arith.cmpi eq, %9, %7 : vector<16x32xi32>
    %11 = arith.extui %10 : vector<16x32xi1> to vector<16x32xi32>
    %12 = arith.sitofp %11 : vector<16x32xi32> to vector<16x32xf32>
    %cst = arith.constant dense<0.000000e+00> : vector<16x32xf32>
    %13 = tpu.matmul %12, %1, %cst {dimension_numbers = #tpu.dot_dimension_numbers<[1], [0], [0], [1], [0, 0, 1, 1], [], []>} : vector<16x32xf32>, vector<32x32xf32>, vector<16x32xf32> -> vector<16x32xf32>
    %c0_10 = arith.constant 0 : index
    %c0_11 = arith.constant 0 : index
    %14 = vector.load %arg3[%c0_10, %c0_11] : memref<16x64xf32, #tpu.memory_space<vmem>>, vector<16x64xf32>
    %cst_12 = arith.constant dense<0.000000e+00> : vector<16x32xf32>
    %15 = tpu.matmul %14, %0, %cst_12 {dimension_numbers = #tpu.dot_dimension_numbers<[1], [0], [0], [1], [0, 0, 1, 1], [], []>} : vector<16x64xf32>, vector<64x32xf32>, vector<16x32xf32> -> vector<16x32xf32>
    %16 = vector.broadcast %3 : vector<1x32xf32> to vector<16x32xf32>
    %17 = arith.addf %15, %16 : vector<16x32xf32>
    %cst_13 = arith.constant 0.000000e+00 : f32
    %18 = vector.broadcast %cst_13 : f32 to vector<16x32xf32>
    %19 = arith.maximumf %17, %18 : vector<16x32xf32>
    %cst_14 = arith.constant dense<0.000000e+00> : vector<16x32xf32>
    %20 = tpu.matmul %19, %2, %cst_14 {dimension_numbers = #tpu.dot_dimension_numbers<[1], [0], [0], [1], [0, 0, 1, 1], [], []>} : vector<16x32xf32>, vector<32x32xf32>, vector<16x32xf32> -> vector<16x32xf32>
    %21 = tpu.iota {dimensions = array<i32: 0>} : vector<16x2xi32>
    %22 = tpu.iota {dimensions = array<i32: 1>} : vector<16x2xi32>
    %c8_i32 = arith.constant 8 : i32
    %23 = vector.broadcast %c8_i32 : i32 to vector<16x2xi32>
    %24 = arith.muli %22, %23 : vector<16x2xi32>
    %25 = arith.cmpi sge, %21, %24 : vector<16x2xi32>
    %c8_i32_15 = arith.constant 8 : i32
    %26 = vector.broadcast %c8_i32_15 : i32 to vector<16x2xi32>
    %27 = arith.addi %24, %26 : vector<16x2xi32>
    %28 = arith.cmpi slt, %21, %27 : vector<16x2xi32>
    %29 = arith.andi %25, %28 : vector<16x2xi1>
    %c0_16 = arith.constant 0 : index
    %c0_17 = arith.constant 0 : index
    %30 = vector.load %arg2[%c0_16, %c0_17] : memref<1x2xf32, #tpu.memory_space<vmem>>, vector<1x2xf32>
    %cst_18 = arith.constant 0.000000e+00 : f32
    %31 = vector.shape_cast %30 : vector<1x2xf32> to vector<1x2xf32>
    %32 = vector.broadcast %31 : vector<1x2xf32> to vector<16x2xf32>
    %33 = vector.broadcast %cst_18 : f32 to vector<16x2xf32>
    %34 = arith.select %29, %32, %33 : vector<16x2xi1>, vector<16x2xf32>
    %cst_19 = arith.constant dense<0.000000e+00> : vector<16xf32>
    %35 = vector.multi_reduction <add>, %34, %cst_19 [1] : vector<16x2xf32> to vector<16xf32>
    %36 = vector.shape_cast %35 : vector<16xf32> to vector<16x1xf32>
    %cst_20 = arith.constant 5.000000e+03 : f32
    %37 = vector.broadcast %cst_20 : f32 to vector<16x1xf32>
    %38 = arith.mulf %37, %36 : vector<16x1xf32>
    %39 = vector.broadcast %38 : vector<16x1xf32> to vector<16x32xf32>
    %40 = vector.broadcast %6 : vector<1x32xf32> to vector<16x32xf32>
    %41 = arith.mulf %39, %40 : vector<16x32xf32>
    %42 = tpu.iota {dimensions = array<i32: 1>} : vector<16x32xi32>
    %c16_i32 = arith.constant 16 : i32
    %43 = vector.broadcast %c16_i32 : i32 to vector<16x32xi32>
    %44 = arith.cmpi slt, %42, %43 : vector<16x32xi32>
    %45 = math.sin %41 : vector<16x32xf32>
    %46 = math.cos %41 : vector<16x32xf32>
    %47 = arith.select %44, %45, %46 : vector<16x32xi1>, vector<16x32xf32>
    %c0_21 = arith.constant 0 : index
    %c0_22 = arith.constant 0 : index
    %48 = vector.load %arg1[%c0_21, %c0_22] : memref<16x1xi32, #tpu.memory_space<vmem>>, vector<16x1xi32>
    %49 = arith.sitofp %48 : vector<16x1xi32> to vector<16x1xf32>
    %50 = arith.addf %13, %20 : vector<16x32xf32>
    %51 = arith.addf %50, %47 : vector<16x32xf32>
    %52 = vector.broadcast %49 : vector<16x1xf32> to vector<16x32xf32>
    %53 = vector.broadcast %5 : vector<1x32xf32> to vector<16x32xf32>
    %54 = arith.mulf %52, %53 : vector<16x32xf32>
    %55 = arith.addf %51, %54 : vector<16x32xf32>
    %56 = vector.broadcast %4 : vector<1x32xf32> to vector<16x32xf32>
    %57 = arith.addf %55, %56 : vector<16x32xf32>
    %c0_23 = arith.constant 0 : index
    %c0_24 = arith.constant 0 : index
    %58 = vector.load %arg5[%c0_23, %c0_24] : memref<16x32xf32, #tpu.memory_space<vmem>>, vector<16x32xf32>
    tpu.vector_store %arg5[%c0_23, %c0_24], %57 {strides = array<i32>} : memref<16x32xf32, #tpu.memory_space<vmem>>, vector<16x32xf32>,
    return
  }
}

</mosaic_0001>

<bundles_post_ra>
// kernel: diff_single_encoder.1
= control target key start
LH: loop header
LB: loop body
LE: loop exit
PB: predicated region body
PF: predicated region fallthrough
CT: control target
= control target key end

     0   :  { %vm55_vm0 = vcmask 523264   ;;  %v1034_v7 = vmov 0   ;;  %s1035_s13 = smov 96   ;;  %s1282_s0 = inlined_call_operand.vmem [shape: s32[16,1], index: 0, kind: input, shape index: {}]   ;;  %s1283_s1 = inlined_call_operand.vmem [shape: s32[16,1], index: 1, kind: input, shape index: {}]   ;;  %s1284_s2 = inlined_call_operand.vmem [shape: f32[1,2], index: 2, kind: input, shape index: {}]   ;;  %s1285_s3 = inlined_call_operand.vmem [shape: f32[16,64], index: 3, kind: input, shape index: {}]   ;;  %s1286_s4 = inlined_call_operand.vmem [shape: f32[72,64], index: 4, kind: input, shape index: {}]   ;;  %s1287_s5 = inlined_call_operand.hbm [shape: f32[16,32], index: 5, kind: output, shape index: {}]  }
   0x1   :  { %v21_v0 = vld [vmem:[%s1286_s4] sm:$0xff]  ;;  %v22_v1 = vld [vmem:[%s1286_s4 + $0x8] sm:$0xff]  ;;  %v23_v2 = vld [vmem:[%s1286_s4 + $0x10] sm:$0xff]  ;;  %990 = vset.pattern.permute.xlu1 %v1034_v7  ;;  %996 = vset.pattern.permute.xlu0 %v1034_v7 }
   0x2   :  { %v926_v3 = vpack.c.bf16 %v22_v1, %v21_v0  ;;  %v24_v4 = vld [vmem:[%s1286_s4 + $0x18] sm:$0xff]  ;;  %v25_v5 = vld [vmem:[%s1286_s4 + $0x20] sm:$0xff]  ;;  %v26_v6 = vld [vmem:[%s1286_s4 + $0x28] sm:$0xff]  ;;  %v991_v12 = vpack.i.bf16 %v22_v1, %v21_v0 }
   0x3   :  { %v930_v8 = vpack.c.bf16 %v24_v4, %v23_v2  ;;  %v49_v9 = vld [vmem:[%s1285_s3] sm:$0xff]  ;;  %v980_v10 = vpack.i.bf16 %v26_v6, %v25_v5  ;;  %v27_v13 = vld [vmem:[%s1286_s4 + $0x30] sm:$0xff]  ;;  %v28_v14 = vld [vmem:[%s1286_s4 + $0x38] sm:$0xff]  ;;  %v934_v15 = vpack.c.bf16 %v26_v6, %v25_v5 }
   0x4   :  { %927 = vmatprep.subr.bf16.mxu0 %v926_v3  ;;  %901 = vmatprep.mubr.msk.f32.mxu0 %vm55_vm0, %v49_v9  ;;  %v35_v11 = vld [vmem:[%s1282_s0] sm:$0xff]  ;;  %v985_v16 = vpack.i.bf16 %v28_v14, %v27_v13 }
   0x5   :  { %929 = vmatpush3.bf16.msra.mxu0 %v926_v3  ;;  %38 = vperm.xlu1 %990, %v35_v11  }
   0x6   :  { %931 = vmatprep.subr.bf16.mxu0 %v930_v8  ;;  %981 = vrot.lane.b32.xlu0 %v980_v10, %s1035_s13 }
   0x7   :  { %10 = vsyncpa [#allocation3], 0  ;;  %v997_v17 = vpack.i.bf16 %v24_v4, %v23_v2  ;;  %v938_v18 = vpack.c.bf16 %v28_v14, %v27_v13  ;;  %v36_v19 = vld [vmem:[%s1282_s0 + $0x8] sm:$0xff]  ;;  %v33_v21 = vlaneseq  ;;  %v841_v27 = vld [vmem:[%s1284_s2] ss:$0 sm:$0xff]  ;;  %vm257_vm7 = vcmask 15360  }
   0x8   :  { %v50_v20 = vld [vmem:[%s1285_s3 + $0x8] sm:$0xff]  ;;  %v689_v33 = vld [vmem:[%s1283_s1] sm:$0xff]  ;;  %vm155_vm8 = vcmask 261120   ;;  %v1036_v60 = vmov 0.0   ;;  %s1043_s28 = smov [#allocation2]  }
   0x9   :  { %933 = vmatpush3.bf16.msra.mxu0 %v930_v8  ;;  %992 = vrot.lane.b32.xlu1 %v991_v12, %s1035_s13  ;;  %v1114_v22 = vand.u32 127, %v33_v21  ;;  %v238_v23 = vshrl.u32 %v33_v21, 7  ;;  %v690_v32 = vld [vmem:[%s1283_s1 + $0x8] sm:$0xff]  ;;  %v691_v35 = vcvt.s32.f32 %v689_v33  ;;  %v836_v49 = vld [vmem:[%s1286_s4 + $0x40] ss:$0 sm:$0xff]  ;;  %s823_s29 = sshll.u32 %s1043_s28, 4  ;;  %s824_s29 = int_to_ptr.vmem [resolvable:$true] %s823_s29 }
   0xa   :  { %935 = vmatprep.subr.bf16.mxu0 %v934_v15  ;;  %986 = vrot.lane.b32.xlu0 %v985_v16, %s1035_s13  ;;  %v692_v34 = vcvt.s32.f32 %v690_v32  ;;  %v842_v3 = vld [vmem:[%s1286_s4 + $0x43] ss:$0 sm:$0xff]  ;;  %v1040_v33 = vmov 920167782   ;;  %s1010_s30 = scalar_lea.vmem %s824_s29, 256  ;;  %p1015_p1 = scmp.lt.s32.totalorder %s824_s29, %s824_s29 }
   0xb   :  { %v240_v24 = vmul.u32 8, %v1114_v22  ;;  %v239_v25 = vadd.s32 8, %v238_v23  ;;  %p1011_p0 = scmp.ne.s32.totalorder %s824_s29, %s1010_s30  ;;  %p1016_p2 = scmp.lt.s32.totalorder %s1010_s30, %s1010_s30 }
   0xd   :  { %937 = vmatpush3.bf16.msra.mxu0 %v934_v15  ;;  %998 = vrot.lane.b32.xlu1 %v997_v17, %s1035_s13  ;;  %v243_v26 = vadd.s32 8, %v240_v24  ;;  %vm242_vm1 = vcmp.ge.s32.totalorder %v239_v25, %v240_v24  ;;  %vm241_vm4 = vcmp.ge.s32.totalorder %v238_v23, %v240_v24  ;;  %p1017_p3 = por %p1016_p2, %p1015_p1 }
   0xe   :  { %939 = vmatprep.subr.bf16.mxu0 %v938_v18  ;;  %41 = vperm.xlu0 %996, %v36_v19  }
   0xf   :  { %vm245_vm2 = vcmp.lt.s32.totalorder %v239_v25, %v243_v26  ;;  %vm244_vm5 = vcmp.lt.s32.totalorder %v238_v23, %v243_v26  ;;  %v1037_v26 = vmov 683565275   ;;  %p1018_p4 = pnand %p1017_p3, %p1011_p0 }
  0x10   :  { %vm247_vm3 = vmand %vm242_vm1, %vm245_vm2 }
  0x11   :  { %941 = vmatpush3.bf16.msra.mxu0 %v938_v18  ;;  %v256_v28 = vsel %vm247_vm3, %v841_v27, 0.0  ;;  %vm246_vm6 = vmand %vm241_vm4, %vm244_vm5 }
  0x12   :  { %v261_v29 = vsel %vm257_vm7, %v256_v28, 0.0  ;;  %v255_v30 = vsel %vm246_vm6, %v841_v27, 0.0  ;;  %v1038_v28 = vmov 2475754826  }
  0x13   :  { %v258_v31 = vsel %vm257_vm7, %v255_v30, 0.0 }
  0x14   :  { %902 = vmatmul.mubr.msk.f32.vlgmr.msra.gmra.mrb[0].mxu0 %vm55_vm0, %v50_v20 }
  0x2d   :  { %262 = vadd.xlane.f32.xlu0 %v261_v29 }
  0x31   :  { %259 = vadd.xlane.f32.xlu1 %v258_v31  ;;  %v1039_v31 = vmov 2102212464  }
  0x42   :  { %799 = vperm.xlu1 %990, %v692_v34  }
  0x43   :  { %794 = vperm.xlu0 %996, %v691_v35   ;;  %v1041_v35 = vmov 2131351028  }
  0x78   :  { %v982_v36 = vpop.permute.xlu0 %981 }
  0x79   :  { %v984_v37 = vunpack.i.h.bf16 %v982_v36  ;;  %v983_v38 = vunpack.i.l.bf16 %v982_v36 }
  0x7b   :  { %v942_v39 = vpack.c.bf16 %v984_v37, %v983_v38  ;;  %v1042_v38 = vmov 1326507024  }
  0x7c   :  { %v987_v40 = vpop.permute.xlu0 %986 }
  0x7d   :  { %v989_v41 = vunpack.i.h.bf16 %v987_v40  ;;  %v988_v42 = vunpack.i.l.bf16 %v987_v40  ;;  %943 = vmatprep.subr.bf16.mxu1 %v942_v39 }
  0x7e   :  { %945 = vmatpush3.bf16.msra.mxu1 %v942_v39 }
  0x7f   :  { %v946_v43 = vpack.c.bf16 %v989_v41, %v988_v42 }
  0x81   :  { %947 = vmatprep.subr.bf16.mxu1 %v946_v43 }
  0x82   :  { %949 = vmatpush3.bf16.msra.mxu1 %v946_v43 }
  0x84   :  { %v39_v44 = vpop.permute.xlu1 %38 }
  0x85   :  { %vm43_vm9 = vcmp.eq.s32.totalorder %v39_v44, %v1114_v22 }
  0x86   :  { %v834_v61 = vsel %vm43_vm9, 1.0, %v1036_v60 }
  0x88   :  { %v993_v45 = vpop.permute.xlu1 %992 }
  0x89   :  { %v995_v46 = vunpack.i.h.bf16 %v993_v45  ;;  %v994_v47 = vunpack.i.l.bf16 %v993_v45 }
  0x8b   :  { %v950_v48 = vpack.c.bf16 %v995_v46, %v994_v47 }
  0x8c   :  { %v999_v50 = vpop.permute.xlu1 %998 }
  0x8d   :  { %951 = vmatprep.subr.bf16.mxu1 %v950_v48  ;;  %v1001_v52 = vunpack.i.h.bf16 %v999_v50  ;;  %v1000_v53 = vunpack.i.l.bf16 %v999_v50  ;;  %v42_v62 = vpop.permute.xlu0 %41 }
  0x8e   :  { %vm44_vm10 = vcmp.eq.s32.totalorder %v42_v62, %v1114_v22 }
  0x8f   :  { %v954_v58 = vpack.c.bf16 %v1001_v52, %v1000_v53  ;;  %v835_v63 = vsel %vm44_vm10, 1.0, %v1036_v60 }
  0xba   :  { %v263_v2 = vpop.xlane.xlu0 %262 }
  0xbb   :  { %v265_v4 = vmul.f32 5000.0, %v263_v2 }
  0xbd   :  { %v1140_v6 = vmul.f32 %v842_v3, %v265_v4 }
  0xbe   :  { %v260_v0 = vpop.xlane.xlu1 %259 }
  0xbf   :  { %v264_v1 = vmul.f32 5000.0, %v260_v0  ;;  %v380_v8 = vand.u32 2139095040, %v1140_v6  ;;  %v377_v23 = vand.u32 2147483647, %v1140_v6 }
  0xc1   :  { %v1138_v5 = vmul.f32 %v842_v3, %v264_v1  ;;  %v381_v10 = vshrl.u32 %v380_v8, 23 }
  0xc3   :  { %v276_v7 = vand.u32 2139095040, %v1138_v5  ;;  %v847_v12 = vadd.s32 4294967169, %v381_v10  ;;  %v273_v19 = vand.u32 2147483647, %v1138_v5  ;;  %vm275_vm10 = vcmp.lt.s32.totalorder %v1138_v5, 0 }
  0xc5   :  { %v277_v9 = vshrl.u32 %v276_v7, 23  ;;  %v387_v14 = vadd.s32 1, %v847_v12  ;;  %v280_v24 = vand.u32 8388607, %v273_v19 }
  0xc7   :  { %v843_v11 = vadd.s32 4294967169, %v277_v9  ;;  %vm388_vm12 = vcmp.gt.s32.totalorder %v387_v14, 0 }
  0xc8   :  { %v389_v16 = vsel %vm388_vm12, %v387_v14, 0  ;;  %vm274_vm12 = vcmp.le.f32.partialorder %v273_v19, 0.7853982 }
  0xc9   :  { %v283_v13 = vadd.s32 1, %v843_v11  ;;  %v391_v18 = vand.u32 31, %v389_v16  ;;  %v1152_v25 = vshrl.u32 %v389_v16, 5 }
  0xcb   :  { %vm284_vm11 = vcmp.gt.s32.totalorder %v283_v13, 0  ;;  %v1147_v21 = vsub.s32 32, %v391_v18  ;;  %v394_v27 = vshll.u32 %v1037_v26, %v391_v18  ;;  %v397_v29 = vshll.u32 %v1038_v28, %v391_v18 }
  0xcc   :  { %v285_v15 = vsel %vm284_vm11, %v283_v13, 0  ;;  %v400_v36 = vshll.u32 %v1041_v35, %v391_v18  ;;  %v403_v40 = vshll.u32 %v1039_v31, %v391_v18  ;;  %v406_v44 = vshll.u32 %v1040_v33, %v391_v18 }
  0xcd   :  { %v287_v17 = vand.u32 31, %v285_v15  ;;  %v1155_v30 = vshrl.u32 %v285_v15, 5  ;;  %v404_v41 = vshrl.u32 %v1040_v33, %v1147_v21  ;;  %v407_v45 = vshrl.u32 %v1042_v38, %v1147_v21 }
  0xce   :  { %v398_v52 = vshrl.u32 %v1041_v35, %v1147_v21  ;;  %v401_v53 = vshrl.u32 %v1039_v31, %v1147_v21  ;;  %vm412_vm15 = vcmp.lt.s32.totalorder %v1152_v25, 4  ;;  %vm409_vm1 = vcmp.lt.s32.totalorder %v1152_v25, 1 }
  0xcf   :  { %v1145_v20 = vsub.s32 32, %v287_v17  ;;  %v299_v32 = vshll.u32 %v1039_v31, %v287_v17  ;;  %v302_v37 = vshll.u32 %v1040_v33, %v287_v17  ;;  %v290_v42 = vshll.u32 %v1037_v26, %v287_v17 }
  0xd0   :  { %v293_v43 = vshll.u32 %v1038_v28, %v287_v17  ;;  %vm308_vm13 = vcmp.lt.s32.totalorder %v1155_v30, 4  ;;  %vm305_vm14 = vcmp.lt.s32.totalorder %v1155_v30, 1  ;;  %vm307_vm0 = vcmp.lt.s32.totalorder %v1155_v30, 3 }
  0xd1   :  { %v300_v34 = vshrl.u32 %v1040_v33, %v1145_v20  ;;  %v303_v39 = vshrl.u32 %v1042_v38, %v1145_v20  ;;  %v291_v46 = vshrl.u32 %v1038_v28, %v1145_v20  ;;  %v294_v47 = vshrl.u32 %v1041_v35, %v1145_v20 }
  0xd2   :  { %v399_v0 = vor.u32 %v398_v52, %v397_v29  ;;  %v402_v1 = vor.u32 %v401_v53, %v400_v36  ;;  %vm411_vm2 = vcmp.lt.s32.totalorder %v1152_v25, 3  ;;  %vm306_vm3 = vcmp.lt.s32.totalorder %v1155_v30, 2 }
  0xd3   :  { %v301_v50 = vor.u32 %v300_v34, %v299_v32  ;;  %v295_v60 = vor.u32 %v294_v47, %v293_v43  ;;  %vm410_vm4 = vcmp.lt.s32.totalorder %v1152_v25, 2  ;;  %v289_v29 = vshrl.u32 %v1037_v26, %v1145_v20 }
  0xd4   :  { %v421_v15 = vsel %vm409_vm1, %v399_v0, %v402_v1  ;;  %v393_v38 = vshrl.u32 %v1037_v26, %v1147_v21  ;;  %vm379_vm11 = vcmp.lt.s32.totalorder %v1140_v6, 0 }
  0xd5   :  { %v314_v62 = vsel %vm308_vm13, %v301_v50, 920167782 }
  0xe7   :  { %v903_v51 = vpop.f32.mrb[0].mxu0 }
  0xe8   :  { %v134_v54 = vadd.f32 %v903_v51, %v836_v49  ;;  %v128_v55 = vpop.f32.mrb[1].mxu0  ;;  %v395_v51 = vshrl.u32 %v1038_v28, %v1147_v21 }
  0xe9   :  { %v129_v56 = vadd.f32 %v836_v49, %v128_v55  ;;  %v297_v49 = vshrl.u32 %v1039_v31, %v1145_v20  ;;  %v384_v55 = vand.u32 8388607, %v377_v23  ;;  %v414_v20 = vsel %vm412_vm15, %v402_v1, 2102212464 }
  0xea   :  { %v138_v59 = vmax.f32 %v134_v54, 0.0  ;;  %v304_v54 = vor.u32 %v303_v39, %v302_v37 }
  0xeb   :  { %v137_v57 = vmax.f32 %v129_v56, 0.0  ;;  %v405_v56 = vor.u32 %v404_v41, %v403_v40  ;;  %v385_v4 = vor.u32 8388608, %v384_v55 }
  0xec   :  { %v318_v2 = vsel %vm308_vm13, %v304_v54, 1326507024 }
  0xed   :  { %912 = vmatprep.mubr.msk.f32.mxu1 %vm155_vm8, %v137_v57  ;;  %v281_v57 = vor.u32 8388608, %v280_v24  ;;  %v418_v3 = vsel %vm412_vm15, %v405_v56, 920167782  ;;  %v319_v11 = vsel %vm307_vm0, %v301_v50, %v318_v2  ;;  %v425_v18 = vshll.u32 %v385_v4, 8 }
  0xee   :  { %913 = vmatmul.mubr.msk.f32.vlgmr.msra.gmra.mrb[0].mxu1 %vm155_vm8, %v138_v59  ;;  %v292_v59 = vor.u32 %v291_v46, %v290_v42  ;;  %v419_v13 = vsel %vm411_vm2, %v402_v1, %v418_v3 }
  0xef   :  { %953 = vmatpush3.bf16.msra.mxu1 %v950_v48  ;;  %923 = vmatprep.mubr.msk.f32.mxu1 %vm155_vm8, %v834_v61  ;;  %v296_v48 = vshll.u32 %v1041_v35, %v287_v17  ;;  %v321_v14 = vshll.u32 %v281_v57, 8 }
  0xf0   :  { %955 = vmatprep.subr.bf16.mxu1 %v954_v58  ;;  %v313_v8 = vsel %vm305_vm14, %v292_v59, %v295_v60  ;;  %v309_v41 = vsel %vm305_vm14, %v289_v29, %v292_v59 }
  0xf1   :  { %v298_v61 = vor.u32 %v297_v49, %v296_v48 }
  0xf3   :  { %957 = vmatpush3.bf16.msra.mxu1 %v954_v58  ;;  %v408_v58 = vor.u32 %v407_v45, %v406_v44  ;;  %v315_v9 = vsel %vm307_vm0, %v298_v61, %v314_v62  ;;  %v317_v10 = vsel %vm305_vm14, %v295_v60, %v298_v61  ;;  %v310_v37 = vsel %vm308_vm13, %v298_v61, 2102212464 }
  0xf4   :  { %v316_v17 = vsel %vm306_vm3, %v313_v8, %v315_v9  ;;  %v320_v24 = vsel %vm306_vm3, %v317_v10, %v319_v11  ;;  %v311_v42 = vsel %vm307_vm0, %v295_v60, %v310_v37  ;;  %v415_v44 = vsel %vm411_vm2, %v399_v0, %v414_v20 }
  0xf5   :  { %v422_v7 = vsel %vm412_vm15, %v408_v58, 1326507024  ;;  %v1212_v31 = vmul.u32.u64.low %v321_v14, %v316_v17  ;;  %v1213_v32 = vmul.u32.u64.high %v321_v14, %v316_v17, %v1212_v31  ;;  %v312_v21 = vsel %vm306_vm3, %v309_v41, %v311_v42 }
  0xf6   :  { %924 = vmatmul.mubr.msk.f32.vlgmr.msra.gmra.mrb[0].mxu1 %vm155_vm8, %v835_v63  ;;  %v396_v63 = vor.u32 %v395_v51, %v394_v27  ;;  %v423_v16 = vsel %vm411_vm2, %v405_v56, %v422_v7  ;;  %v1215_v33 = vmul.u32.u64.low %v321_v14, %v320_v24  ;;  %v1216_v34 = vmul.u32.u64.high %v321_v14, %v320_v24, %v1215_v33 }
  0xf7   :  { %v424_v28 = vsel %vm410_vm4, %v421_v15, %v423_v16  ;;  %v331_v26 = vadd.s32 1, %v1213_v32  ;;  %v328_v47 = vmul.u32 %v321_v14, %v312_v21  ;;  %vm378_vm13 = vcmp.le.f32.partialorder %v377_v23, 0.7853982 }
  0xf8   :  { %v417_v12 = vsel %vm409_vm1, %v396_v63, %v399_v0  ;;  %v1225_v39 = vmul.u32.u64.low %v425_v18, %v424_v28  ;;  %v1226_v40 = vmul.u32.u64.high %v425_v18, %v424_v28, %v1225_v39  ;;  %v413_v43 = vsel %vm409_vm1, %v393_v38, %v396_v63 }
  0xf9   :  { %v420_v27 = vsel %vm410_vm4, %v417_v12, %v419_v13  ;;  %vm330_vm5 = vc.u32 %v1216_v34, %v1212_v31  ;;  %v416_v45 = vsel %vm410_vm4, %v413_v43, %v415_v44  ;;  %v329_v9 = vadd.s32 %v1212_v31, %v1216_v34 }
  0xfa   :  { %v1218_v35 = vmul.u32.u64.low %v425_v18, %v420_v27  ;;  %v1219_v36 = vmul.u32.u64.high %v425_v18, %v420_v27, %v1218_v35  ;;  %v332_v48 = vsel %vm330_vm5, %v331_v26, %v1213_v32  ;;  %v432_v49 = vmul.u32 %v425_v18, %v416_v45 }
  0xfb   :  { %v333_v51 = vadd.s32 %v332_v48, %v328_v47 }
  0xfc   :  { %v435_v46 = vadd.s32 1, %v1219_v36  ;;  %vm434_vm6 = vc.u32 %v1226_v40, %v1218_v35  ;;  %v433_v12 = vadd.s32 %v1218_v35, %v1226_v40 }
  0xfd   :  { %v334_v52 = vadd.s32 536870912, %v333_v51 }
  0xfe   :  { %v436_v50 = vsel %vm434_vm6, %v435_v46, %v1219_v36 }
  0xff   :  { %v437_v30 = vadd.s32 %v436_v50, %v432_v49  ;;  %v335_v54 = vshrl.u32 %v334_v52, 30 }
 0x101   :  { %v438_v53 = vadd.s32 536870912, %v437_v30  ;;  %v336_v56 = vshll.u32 %v335_v54, 30  ;;  %v359_v21 = vsub.s32 4, %v335_v54 }
 0x103   :  { %v439_v55 = vshrl.u32 %v438_v53, 30  ;;  %v337_v25 = vsub.s32 %v333_v51, %v336_v56  ;;  %v360_v45 = vsel %vm275_vm10, %v359_v21, %v335_v54 }
 0x104   :  { %v362_v47 = vsel %vm274_vm12, 0, %v360_v45 }
 0x105   :  { %v440_v57 = vshll.u32 %v439_v55, 30  ;;  %v339_v59 = vsub.s32 0, %v337_v25  ;;  %v463_v42 = vsub.s32 4, %v439_v55  ;;  %v366_v19 = vadd.s32 3, %v362_v47 }
 0x106   :  { %v574_v56 = vand.u32 3, %v362_v47 }
 0x107   :  { %v441_v58 = vsub.s32 %v437_v30, %v440_v57  ;;  %v844_v61 = vmin.u32 %v339_v59, %v337_v25  ;;  %v464_v26 = vsel %vm379_vm11, %v463_v42, %v439_v55  ;;  %v367_v53 = vand.u32 3, %v366_v19 }
 0x108   :  { %v466_v46 = vsel %vm378_vm13, 0, %v464_v26  ;;  %vm576_vm4 = vcmp.eq.s32.totalorder %v574_v56, 0  ;;  %vm579_vm5 = vcmp.eq.s32.totalorder %v574_v56, 2 }
 0x109   :  { %v443_v60 = vsub.s32 0, %v441_v58  ;;  %v341_v63 = vclz %v844_v61  ;;  %v470_v48 = vadd.s32 3, %v466_v46  ;;  %v677_v23 = vand.u32 3, %v466_v46 }
 0x10a   :  { %vm369_vm2 = vcmp.eq.s32.totalorder %v367_v53, 0  ;;  %vm372_vm3 = vcmp.eq.s32.totalorder %v367_v53, 2 }
 0x10b   :  { %v848_v62 = vmin.u32 %v443_v60, %v441_v58  ;;  %v845_v1 = vadd.s32 4294967294, %v341_v63  ;;  %v471_v51 = vand.u32 3, %v470_v48  ;;  %vm679_vm15 = vcmp.eq.s32.totalorder %v677_v23, 0 }
 0x10c   :  { %vm682_vm1 = vcmp.eq.s32.totalorder %v677_v23, 2 }
 0x10d   :  { %v445_v0 = vclz %v848_v62  ;;  %vm846_vm7 = vcmp.lt.s32.totalorder %v845_v1, 0  ;;  %vm473_vm14 = vcmp.eq.s32.totalorder %v471_v51, 0  ;;  %vm476_vm0 = vcmp.eq.s32.totalorder %v471_v51, 2 }
 0x10e   :  { %v344_v3 = vsel %vm846_vm7, 0, %v845_v1  ;;  %vm472_vm6 = vcmp.lt.s32.totalorder %v471_v51, 2  ;;  %vm678_vm7 = vcmp.lt.s32.totalorder %v677_v23, 2 }
 0x10f   :  { %v849_v2 = vadd.s32 4294967294, %v445_v0  ;;  %v349_v7 = vsub.s32 4294967266, %v344_v3  ;;  %v345_v10 = vsub.s32 32, %v344_v3  ;;  %v346_v15 = vshll.u32 %v337_v25, %v344_v3 }
 0x111   :  { %vm850_vm9 = vcmp.lt.s32.totalorder %v849_v2, 0  ;;  %v350_v11 = vadd.s32 127, %v349_v7  ;;  %v347_v16 = vshrl.u32 %v329_v9, %v345_v10  ;;  %v861_v10 = vld [vmem:[%s1286_s4 + $0x42] ss:$0 sm:$0xff] }
 0x112   :  { %v448_v4 = vsel %vm850_vm9, 0, %v849_v2  ;;  %vm368_vm9 = vcmp.lt.s32.totalorder %v367_v53, 2 }
 0x113   :  { %v453_v8 = vsub.s32 4294967266, %v448_v4  ;;  %v449_v13 = vsub.s32 32, %v448_v4  ;;  %v351_v17 = vshll.u32 %v350_v11, 23  ;;  %v450_v18 = vshll.u32 %v441_v58, %v448_v4  ;;  %v800_v11 = vpop.permute.xlu1 %799 }
 0x114   :  { %v348_v28 = vor.u32 %v347_v16, %v346_v15  ;;  %v807_v16 = vmul.f32 %v861_v10, %v800_v11 }
 0x115   :  { %v454_v14 = vadd.s32 127, %v453_v8  ;;  %v451_v24 = vshrl.u32 %v433_v12, %v449_v13  ;;  %v352_v29 = vor.u32 4788187, %v351_v17 }
 0x116   :  { %v355_v37 = vcvt.s32.f32 %v348_v28 }
 0x117   :  { %v455_v27 = vshll.u32 %v454_v14, 23  ;;  %v452_v32 = vor.u32 %v451_v24, %v450_v18  ;;  %v353_v36 = vand.u32 2147483647, %v352_v29  ;;  %v795_v14 = vpop.permute.xlu0 %794 }
 0x118   :  { %v806_v24 = vmul.f32 %v861_v10, %v795_v14 }
 0x119   :  { %v456_v33 = vor.u32 4788187, %v455_v27  ;;  %v459_v31 = vcvt.s32.f32 %v452_v32  ;;  %v356_v34 = vmul.f32 %v355_v37, %v353_v36 }
 0x11b   :  { %v457_v38 = vand.u32 2147483647, %v456_v33  ;;  %v357_v20 = vxor.u32 2147483648, %v356_v34 }
 0x11d   :  { %v460_v39 = vmul.f32 %v459_v31, %v457_v38  ;;  %v358_v40 = vsel %vm275_vm10, %v357_v20, %v356_v34  ;;  %vm575_vm10 = vcmp.lt.s32.totalorder %v574_v56, 2 }
 0x11e   :  { %v361_v43 = vsel %vm274_vm12, %v1138_v5, %v358_v40  ;;  %vm365_vm12 = vweird.f32 %v1138_v5 }
 0x11f   :  { %v461_v35 = vxor.u32 2147483648, %v460_v39  ;;  %1002 = vcosq.f32 %v361_v43 }
 0x121   :  { %v462_v41 = vsel %vm379_vm11, %v461_v35, %v460_v39  ;;  %vm469_vm11 = vweird.f32 %v1140_v6 }
 0x122   :  { %v465_v44 = vsel %vm378_vm13, %v1140_v6, %v462_v41  ;;  %vm272_vm13 = vcmp.lt.s32.totalorder %v1114_v22, 16  ;;  %v862_v22 = vld [vmem:[%s1286_s4 + $0x41] ss:$0 sm:$0xff] }
 0x123   :  { %1004 = vcosq.f32 %v465_v44 }
 0x124   :  { %1006 = vsinq.f32 %v465_v44 }
 0x125   :  { %1008 = vsinq.f32 %v361_v43 }
 0x129   :  { %v1003_v49 = vpop.eup %1002 }
 0x12a   :  { %v373_v55 = vxor.u32 2147483648, %v1003_v49 }
 0x12d   :  { %v1005_v50 = vpop.eup %1004 }
 0x12e   :  { %v1007_v30 = vpop.eup %1006  ;;  %v477_v25 = vxor.u32 2147483648, %v1005_v50 }
 0x12f   :  { %v1009_v52 = vpop.eup %1008  ;;  %v474_v57 = vxor.u32 2147483648, %v1007_v30 }
 0x130   :  { %v370_v54 = vxor.u32 2147483648, %v1009_v52  ;;  %v478_v59 = vsel %vm476_vm0, %v477_v25, %v1007_v30  ;;  %v684_v61 = vsel %vm682_vm1, %v477_v25, %v1007_v30  ;;  %v374_v63 = vsel %vm372_vm3, %v373_v55, %v1009_v52 }
 0x131   :  { %v475_v58 = vsel %vm473_vm14, %v1005_v50, %v474_v57  ;;  %v681_v60 = vsel %vm679_vm15, %v1005_v50, %v474_v57  ;;  %v581_v1 = vsel %vm579_vm5, %v373_v55, %v1009_v52 }
 0x132   :  { %v371_v62 = vsel %vm369_vm2, %v1003_v49, %v370_v54  ;;  %v578_v0 = vsel %vm576_vm4, %v1003_v49, %v370_v54  ;;  %v479_v2 = vsel %vm472_vm6, %v475_v58, %v478_v59  ;;  %v685_v3 = vsel %vm678_vm7, %v681_v60, %v684_v61 }
 0x133   :  { %v375_v4 = vsel %vm368_vm9, %v371_v62, %v374_v63  ;;  %v582_v7 = vsel %vm575_vm10, %v578_v0, %v581_v1  ;;  %v480_v8 = vsel %vm469_vm11, nan, %v479_v2  ;;  %v686_v9 = vsel %vm469_vm11, nan, %v685_v3 }
 0x134   :  { %v376_v12 = vsel %vm365_vm12, nan, %v375_v4  ;;  %v583_v13 = vsel %vm365_vm12, nan, %v582_v7  ;;  %v688_v15 = vsel %vm272_vm13, %v480_v8, %v686_v9 }
 0x135   :  { %v687_v18 = vsel %vm272_vm13, %v376_v12, %v583_v13 }
 0x1c9   :  { %v925_v6 = vpop.f32.mrb[0].mxu1 }
 0x1ca   :  { %v791_v17 = vadd.f32 %v925_v6, %v688_v15  ;;  %v781_v5 = vpop.f32.mrb[1].mxu1 }
 0x1cb   :  { %v790_v27 = vadd.f32 %v781_v5, %v687_v18 }
 0x1cc   :  { %v809_v28 = vadd.f32 %v807_v16, %v791_v17 }
 0x1cd   :  { %v808_v29 = vadd.f32 %v806_v24, %v790_v27 }
 0x1ce   :  { %v815_v32 = vadd.f32 %v862_v22, %v809_v28 }
 0x1cf   :  { %v814_v33 = vadd.f32 %v862_v22, %v808_v29 }
 0x1d0   :  { %817 = vst.msk [vmem:[#allocation2 + $0x8] sm:$0xff] %vm155_vm8, %v815_v32 }
 0x1d1   :  { %816 = vst.msk [vmem:[#allocation2] sm:$0xff] %vm155_vm8, %v814_v33 }
 0x1d2   :  { %1021 = shalt.err (!%p1018_p4)
}
 0x1d3   :  { %s1022_s7 = scalar_lea.hbm %s1287_s5, 256 }
 0x1d4   :  { %p1023_p5 = scmp.ne.s32.totalorder %s1287_s5, %s1022_s7  ;;  %p1026_p6 = scmp.lt.u32.totalorder %s1022_s7, %s1287_s5 }
 0x1d6   :  { %p1028_p7 = pnand %p1026_p6, %p1023_p5 }
 0x1d8   :  { %1031 = shalt.err (!%p1028_p7)
}
 0x1d9   :  { %s1044_s12 = smov 128   ;;  %s1045_s13 = smov 8  }
 0x1da   :  { %829 = dma.vmem_to_hbm [thread:$0]  %s824_s29, 256, %s1287_s5, [#allocation3], %s1044_s12, %s1044_s12, %s1045_s13  }
 0x1db   :  { %1032 = dma.done.wait [#allocation3], 256  }
 0x1dc   :  { %1033 = vsyncadd [#allocation3], 4294967040 }
 0x1dd   :  { %833 = vsyncpa [#allocation3], 1 }

</bundles_post_ra>
